<compile_context>
chip_gen: v6e
topology: v6e:2x2x1
jax: 0.10.0
libtpu: 0.0.40
codegen_flags: <defaults>
</compile_context>

<pallas_src>
import functools

import jax
import jax.numpy as jnp
from jax import lax
from jax.experimental import pallas as pl
from jax.experimental.pallas import tpu as pltpu

POS_WEIGHT = 3.0
_MAX_BLOCK_ELEMS = 1 << 19   # 524288 elems = 2 MiB f32 per input buffer


def _rcf_loss_kernel(*refs, num_preds, valid_elems, tile_rows, lane, needs_mask):
    """refs = (num_preds logit refs, target ref, out ref)."""
    logit_refs = refs[:num_preds]
    target_ref = refs[num_preds]
    out_ref = refs[num_preds + 1]

    y = target_ref[...].astype(jnp.float32)          # (tile_rows, lane)

    if needs_mask:
        # Boundary blocks / lane padding: zero out contributions from lanes
        # past the real element count (their VMEM contents are unspecified).
        i = pl.program_id(0)
        row = lax.broadcasted_iota(jnp.int32, (tile_rows, lane), 0)
        col = lax.broadcasted_iota(jnp.int32, (tile_rows, lane), 1)
        gidx = (i * tile_rows + row) * lane + col
        valid = gidx < valid_elems
    else:
        valid = None

    # Unrolled over the K prediction slices (K is a trace-time constant).
    # Each slice is reduced straight to a scalar: no tile-sized accumulator
    # or derived-from-y tiles kept live across the loop.
    acc = jnp.float32(0.0)
    for lref in logit_refs:
        x = lref[...].astype(jnp.float32)
        # Numerically-stable pos-weighted BCE-with-logits (matches PyTorch):
        #   L = (1-y)*x + (1 + (pw-1)*y) * (max(-x,0) + log1p(exp(-|x|)))
        softplus_neg_x = jnp.maximum(-x, 0.0) + jnp.log1p(jnp.exp(-jnp.abs(x)))
        contrib = (1.0 - y) * x + (1.0 + (POS_WEIGHT - 1.0) * y) * softplus_neg_x
        if needs_mask:
            contrib = jnp.where(valid, contrib, 0.0)
        acc = acc + jnp.sum(contrib)

    # Per-tile partial sum, broadcast into a dense (8,128) output block
    # (unmasked lane-dense store; wrapper reads element [tile*8, 0]).
    out_ref[...] = jnp.full((8, 128), acc, dtype=jnp.float32)


@jax.jit
def rcf_loss(ps, p, target):
    """ps: list of (N, C_i, H, W) logits; p: (N, C, H, W) logits; target: (N, H, W)."""
    n, _, h, w = p.shape
    e = n * h * w

    preds = [p] + list(ps)
    k = len(preds)

    # Lane-dense layout: pick the widest lane width in {512, 256, 128} that
    # divides the flattened pixel count so the (rows, lane) view is a free
    # reshape (no padding copy through HBM).
    lane = next((c for c in (512, 256, 128) if e % c == 0), None)
    needs_pad = lane is None
    if needs_pad:
        lane = 128                      # rare fallback: pad up to 127 elements
    rows = pl.cdiv(e, lane)
    padded_e = rows * lane

    # Row-tile selection: big tiles amortize per-grid-step overhead, but keep
    # >= 2 tiles when there is enough data (megacore / v7x two TensorCores)
    # and cap each buffer at 2 MiB f32 so (K+1) double-buffered inputs fit
    # comfortably in v7x's 64 MiB VMEM.
    max_tile_rows = max(8, (_MAX_BLOCK_ELEMS // lane) // 8 * 8)
    if rows < 16:
        tile_rows = rows                # single block == full sublane extent
    else:
        half = (pl.cdiv(rows, 2) + 7) // 8 * 8
        tile_rows = min(max_tile_rows, half)
    num_tiles = pl.cdiv(rows, tile_rows)
    needs_mask = num_tiles * tile_rows * lane != e

    def to_layout(x):
        flat = x.reshape(-1)
        if needs_pad:
            # Only hit when N*H*W is not a multiple of 128; otherwise no copy.
            flat = jnp.pad(flat, (0, padded_e - e))
        return flat.reshape(rows, lane)

    # Channel 0 of every prediction, kept in native dtype (cast happens in VMEM).
    # NOTE: for C == 1 (standard RCF) pr[:, 0] is a free squeeze; for C > 1 it
    # would materialize a strided copy — slice channel 0 at the producer then.
    logit_arrays = [to_layout(pr[:, 0]) for pr in preds]
    tgt = to_layout(target)             # original dtype; kernel casts to f32

    kernel = functools.partial(
        _rcf_loss_kernel,
        num_preds=k, valid_elems=e,
        tile_rows=tile_rows, lane=lane, needs_mask=needs_mask)

    in_block = pl.BlockSpec((tile_rows, lane), lambda i: (i, 0))

    block_bytes = tile_rows * lane * 4
    vmem_limit = min(max((k + 1) * 2 * block_bytes + (4 << 20), 16 << 20),
                     100 << 20)

    itemsize = jnp.dtype(p.dtype).itemsize
    cost = pl.CostEstimate(
        flops=8 * k * e,
        transcendentals=2 * k * e,
        bytes_accessed=(k + 1) * e * itemsize + num_tiles * 8 * 128 * 4)

    partials = pl.pallas_call(
        kernel,
        out_shape=jax.ShapeDtypeStruct((num_tiles * 8, 128), jnp.float32),
        grid_spec=pltpu.PrefetchScalarGridSpec(
            num_scalar_prefetch=0,
            grid=(num_tiles,),
            in_specs=[in_block] * (k + 1),
            out_specs=pl.BlockSpec((8, 128), lambda i: (i, 0)),
        ),
        compiler_params=pltpu.CompilerParams(
            dimension_semantics=("parallel",),
            vmem_limit_bytes=vmem_limit),
        cost_estimate=cost,
    )(*logit_arrays, tgt)

    # Element [tile*8, 0] holds that tile's partial sum.
    per_tile = partials[0::8, 0]
    # sum over all slices / per-slice element count / K == (sum of per-slice means) / K
    return jnp.sum(per_tile) / jnp.float32(k * e)


def _reference_loss(ps, p, target):
    def bce(x, y):
        sp = jnp.maximum(-x, 0.0) + jnp.log1p(jnp.exp(-jnp.abs(x)))
        per = (1.0 - y) * x + (1.0 + (POS_WEIGHT - 1.0) * y) * sp
        return jnp.mean(per)

    y = target.astype(jnp.float32)
    loss = bce(p[:, 0].astype(jnp.float32), y)
    for pi in ps:
        loss = loss + bce(pi[:, 0].astype(jnp.float32), y)
    return loss / (len(ps) + 1)


def _run_case(key, n, h, w, n_side=5):
    keys = jax.random.split(key, n_side + 2)
    p = jax.random.normal(keys[0], (n, 1, h, w), dtype=jnp.float32)
    ps = [jax.random.normal(keys[i + 1], (n, 1, h, w), dtype=jnp.float32)
          for i in range(n_side)]
    target = (jax.random.uniform(keys[-1], (n, h, w)) > 0.5).astype(jnp.float32)

    loss = jax.block_until_ready(rcf_loss(ps, p, target))
    ref = _reference_loss(ps, p, target)
    assert jnp.allclose(loss, ref, rtol=1e-5, atol=1e-5), (n, h, w, loss, ref)


if __name__ == "__main__":
    key = jax.random.PRNGKey(0)
    k0, k1, k2 = jax.random.split(key, 3)

    # Primary small case (RCF: 5 side outputs + 1 fused prediction).
    _run_case(k0, 2, 16, 16)
    # Ragged case (e not a multiple of 128): exercises pad fallback + mask.
    _run_case(k1, 2, 20, 20)
    # Multi-tile case with a partial boundary block: exercises parallel grid + mask.
    _run_case(k2, 2, 64, 72)

    print("KERNEL_OK")
</pallas_src>

<mosaic_0001>
module attributes {stable_mosaic.version = 11 : i64} {
  func.func @_rcf_loss_kernel(%arg0: i32, %arg1: memref<1x512xf32, #tpu.memory_space<vmem>>, %arg2: memref<1x512xf32, #tpu.memory_space<vmem>>, %arg3: memref<1x512xf32, #tpu.memory_space<vmem>>, %arg4: memref<1x512xf32, #tpu.memory_space<vmem>>, %arg5: memref<1x512xf32, #tpu.memory_space<vmem>>, %arg6: memref<1x512xf32, #tpu.memory_space<vmem>>, %arg7: memref<1x512xf32, #tpu.memory_space<vmem>>, %arg8: memref<8x128xf32, #tpu.memory_space<vmem>>) attributes {dimension_semantics = [#tpu.dimension_semantics<parallel>], iteration_bounds = array<i64: 1>, scalar_prefetch = 0 : i64, scratch_operands = 0 : i64, tpu.core_type = #tpu.core_type<tc>, window_params = [{transform_indices = @transform_0, window_bounds = array<i64: 1, 512>}, {transform_indices = @transform_1, window_bounds = array<i64: 1, 512>}, {transform_indices = @transform_2, window_bounds = array<i64: 1, 512>}, {transform_indices = @transform_3, window_bounds = array<i64: 1, 512>}, {transform_indices = @transform_4, window_bounds = array<i64: 1, 512>}, {transform_indices = @transform_5, window_bounds = array<i64: 1, 512>}, {transform_indices = @transform_6, window_bounds = array<i64: 1, 512>}, {transform_indices = @transform_7, window_bounds = array<i64: 8, 128>}]} {
    %c0 = arith.constant 0 : index
    %c0_0 = arith.constant 0 : index
    %0 = vector.load %arg7[%c0, %c0_0] : memref<1x512xf32, #tpu.memory_space<vmem>>, vector<1x512xf32>
    %c0_1 = arith.constant 0 : index
    %c0_2 = arith.constant 0 : index
    %1 = vector.load %arg1[%c0_1, %c0_2] : memref<1x512xf32, #tpu.memory_space<vmem>>, vector<1x512xf32>
    %cst = arith.constant 0.000000e+00 : f32
    %2 = vector.broadcast %cst : f32 to vector<1x512xf32>
    %3 = arith.subf %2, %1 : vector<1x512xf32>
    %cst_3 = arith.constant 0.000000e+00 : f32
    %4 = vector.broadcast %cst_3 : f32 to vector<1x512xf32>
    %5 = arith.maximumf %3, %4 : vector<1x512xf32>
    %6 = math.absf %1 : vector<1x512xf32>
    %cst_4 = arith.constant 0.000000e+00 : f32
    %7 = vector.broadcast %cst_4 : f32 to vector<1x512xf32>
    %8 = arith.subf %7, %6 : vector<1x512xf32>
    %9 = math.exp %8 : vector<1x512xf32>
    %10 = math.log1p %9 : vector<1x512xf32>
    %11 = arith.addf %5, %10 : vector<1x512xf32>
    %cst_5 = arith.constant 1.000000e+00 : f32
    %12 = vector.broadcast %cst_5 : f32 to vector<1x512xf32>
    %13 = arith.subf %12, %0 : vector<1x512xf32>
    %14 = arith.mulf %13, %1 : vector<1x512xf32>
    %cst_6 = arith.constant 2.000000e+00 : f32
    %15 = vector.broadcast %cst_6 : f32 to vector<1x512xf32>
    %16 = arith.mulf %15, %0 : vector<1x512xf32>
    %cst_7 = arith.constant 1.000000e+00 : f32
    %17 = vector.broadcast %cst_7 : f32 to vector<1x512xf32>
    %18 = arith.addf %17, %16 : vector<1x512xf32>
    %19 = arith.mulf %18, %11 : vector<1x512xf32>
    %20 = arith.addf %14, %19 : vector<1x512xf32>
    %21 = vector.shape_cast %20 : vector<1x512xf32> to vector<1x1x512xf32>
    %cst_8 = arith.constant dense<0.000000e+00> : vector<1xf32>
    %22 = vector.multi_reduction <add>, %21, %cst_8 [1, 2] : vector<1x1x512xf32> to vector<1xf32>
    %23 = vector.shape_cast %22 : vector<1xf32> to vector<1x1x1xf32>
    %24 = vector.extract %23[0, 0, 0] : f32 from vector<1x1x1xf32>
    %cst_9 = arith.constant 0.000000e+00 : f32
    %25 = arith.addf %cst_9, %24 : f32
    %c0_10 = arith.constant 0 : index
    %c0_11 = arith.constant 0 : index
    %26 = vector.load %arg2[%c0_10, %c0_11] : memref<1x512xf32, #tpu.memory_space<vmem>>, vector<1x512xf32>
    %cst_12 = arith.constant 0.000000e+00 : f32
    %27 = vector.broadcast %cst_12 : f32 to vector<1x512xf32>
    %28 = arith.subf %27, %26 : vector<1x512xf32>
    %cst_13 = arith.constant 0.000000e+00 : f32
    %29 = vector.broadcast %cst_13 : f32 to vector<1x512xf32>
    %30 = arith.maximumf %28, %29 : vector<1x512xf32>
    %31 = math.absf %26 : vector<1x512xf32>
    %cst_14 = arith.constant 0.000000e+00 : f32
    %32 = vector.broadcast %cst_14 : f32 to vector<1x512xf32>
    %33 = arith.subf %32, %31 : vector<1x512xf32>
    %34 = math.exp %33 : vector<1x512xf32>
    %35 = math.log1p %34 : vector<1x512xf32>
    %36 = arith.addf %30, %35 : vector<1x512xf32>
    %cst_15 = arith.constant 1.000000e+00 : f32
    %37 = vector.broadcast %cst_15 : f32 to vector<1x512xf32>
    %38 = arith.subf %37, %0 : vector<1x512xf32>
    %39 = arith.mulf %38, %26 : vector<1x512xf32>
    %cst_16 = arith.constant 2.000000e+00 : f32
    %40 = vector.broadcast %cst_16 : f32 to vector<1x512xf32>
    %41 = arith.mulf %40, %0 : vector<1x512xf32>
    %cst_17 = arith.constant 1.000000e+00 : f32
    %42 = vector.broadcast %cst_17 : f32 to vector<1x512xf32>
    %43 = arith.addf %42, %41 : vector<1x512xf32>
    %44 = arith.mulf %43, %36 : vector<1x512xf32>
    %45 = arith.addf %39, %44 : vector<1x512xf32>
    %46 = vector.shape_cast %45 : vector<1x512xf32> to vector<1x1x512xf32>
    %cst_18 = arith.constant dense<0.000000e+00> : vector<1xf32>
    %47 = vector.multi_reduction <add>, %46, %cst_18 [1, 2] : vector<1x1x512xf32> to vector<1xf32>
    %48 = vector.shape_cast %47 : vector<1xf32> to vector<1x1x1xf32>
    %49 = vector.extract %48[0, 0, 0] : f32 from vector<1x1x1xf32>
    %50 = arith.addf %25, %49 : f32
    %c0_19 = arith.constant 0 : index
    %c0_20 = arith.constant 0 : index
    %51 = vector.load %arg3[%c0_19, %c0_20] : memref<1x512xf32, #tpu.memory_space<vmem>>, vector<1x512xf32>
    %cst_21 = arith.constant 0.000000e+00 : f32
    %52 = vector.broadcast %cst_21 : f32 to vector<1x512xf32>
    %53 = arith.subf %52, %51 : vector<1x512xf32>
    %cst_22 = arith.constant 0.000000e+00 : f32
    %54 = vector.broadcast %cst_22 : f32 to vector<1x512xf32>
    %55 = arith.maximumf %53, %54 : vector<1x512xf32>
    %56 = math.absf %51 : vector<1x512xf32>
    %cst_23 = arith.constant 0.000000e+00 : f32
    %57 = vector.broadcast %cst_23 : f32 to vector<1x512xf32>
    %58 = arith.subf %57, %56 : vector<1x512xf32>
    %59 = math.exp %58 : vector<1x512xf32>
    %60 = math.log1p %59 : vector<1x512xf32>
    %61 = arith.addf %55, %60 : vector<1x512xf32>
    %cst_24 = arith.constant 1.000000e+00 : f32
    %62 = vector.broadcast %cst_24 : f32 to vector<1x512xf32>
    %63 = arith.subf %62, %0 : vector<1x512xf32>
    %64 = arith.mulf %63, %51 : vector<1x512xf32>
    %cst_25 = arith.constant 2.000000e+00 : f32
    %65 = vector.broadcast %cst_25 : f32 to vector<1x512xf32>
    %66 = arith.mulf %65, %0 : vector<1x512xf32>
    %cst_26 = arith.constant 1.000000e+00 : f32
    %67 = vector.broadcast %cst_26 : f32 to vector<1x512xf32>
    %68 = arith.addf %67, %66 : vector<1x512xf32>
    %69 = arith.mulf %68, %61 : vector<1x512xf32>
    %70 = arith.addf %64, %69 : vector<1x512xf32>
    %71 = vector.shape_cast %70 : vector<1x512xf32> to vector<1x1x512xf32>
    %cst_27 = arith.constant dense<0.000000e+00> : vector<1xf32>
    %72 = vector.multi_reduction <add>, %71, %cst_27 [1, 2] : vector<1x1x512xf32> to vector<1xf32>
    %73 = vector.shape_cast %72 : vector<1xf32> to vector<1x1x1xf32>
    %74 = vector.extract %73[0, 0, 0] : f32 from vector<1x1x1xf32>
    %75 = arith.addf %50, %74 : f32
    %c0_28 = arith.constant 0 : index
    %c0_29 = arith.constant 0 : index
    %76 = vector.load %arg4[%c0_28, %c0_29] : memref<1x512xf32, #tpu.memory_space<vmem>>, vector<1x512xf32>
    %cst_30 = arith.constant 0.000000e+00 : f32
    %77 = vector.broadcast %cst_30 : f32 to vector<1x512xf32>
    %78 = arith.subf %77, %76 : vector<1x512xf32>
    %cst_31 = arith.constant 0.000000e+00 : f32
    %79 = vector.broadcast %cst_31 : f32 to vector<1x512xf32>
    %80 = arith.maximumf %78, %79 : vector<1x512xf32>
    %81 = math.absf %76 : vector<1x512xf32>
    %cst_32 = arith.constant 0.000000e+00 : f32
    %82 = vector.broadcast %cst_32 : f32 to vector<1x512xf32>
    %83 = arith.subf %82, %81 : vector<1x512xf32>
    %84 = math.exp %83 : vector<1x512xf32>
    %85 = math.log1p %84 : vector<1x512xf32>
    %86 = arith.addf %80, %85 : vector<1x512xf32>
    %cst_33 = arith.constant 1.000000e+00 : f32
    %87 = vector.broadcast %cst_33 : f32 to vector<1x512xf32>
    %88 = arith.subf %87, %0 : vector<1x512xf32>
    %89 = arith.mulf %88, %76 : vector<1x512xf32>
    %cst_34 = arith.constant 2.000000e+00 : f32
    %90 = vector.broadcast %cst_34 : f32 to vector<1x512xf32>
    %91 = arith.mulf %90, %0 : vector<1x512xf32>
    %cst_35 = arith.constant 1.000000e+00 : f32
    %92 = vector.broadcast %cst_35 : f32 to vector<1x512xf32>
    %93 = arith.addf %92, %91 : vector<1x512xf32>
    %94 = arith.mulf %93, %86 : vector<1x512xf32>
    %95 = arith.addf %89, %94 : vector<1x512xf32>
    %96 = vector.shape_cast %95 : vector<1x512xf32> to vector<1x1x512xf32>
    %cst_36 = arith.constant dense<0.000000e+00> : vector<1xf32>
    %97 = vector.multi_reduction <add>, %96, %cst_36 [1, 2] : vector<1x1x512xf32> to vector<1xf32>
    %98 = vector.shape_cast %97 : vector<1xf32> to vector<1x1x1xf32>
    %99 = vector.extract %98[0, 0, 0] : f32 from vector<1x1x1xf32>
    %100 = arith.addf %75, %99 : f32
    %c0_37 = arith.constant 0 : index
    %c0_38 = arith.constant 0 : index
    %101 = vector.load %arg5[%c0_37, %c0_38] : memref<1x512xf32, #tpu.memory_space<vmem>>, vector<1x512xf32>
    %cst_39 = arith.constant 0.000000e+00 : f32
    %102 = vector.broadcast %cst_39 : f32 to vector<1x512xf32>
    %103 = arith.subf %102, %101 : vector<1x512xf32>
    %cst_40 = arith.constant 0.000000e+00 : f32
    %104 = vector.broadcast %cst_40 : f32 to vector<1x512xf32>
    %105 = arith.maximumf %103, %104 : vector<1x512xf32>
    %106 = math.absf %101 : vector<1x512xf32>
    %cst_41 = arith.constant 0.000000e+00 : f32
    %107 = vector.broadcast %cst_41 : f32 to vector<1x512xf32>
    %108 = arith.subf %107, %106 : vector<1x512xf32>
    %109 = math.exp %108 : vector<1x512xf32>
    %110 = math.log1p %109 : vector<1x512xf32>
    %111 = arith.addf %105, %110 : vector<1x512xf32>
    %cst_42 = arith.constant 1.000000e+00 : f32
    %112 = vector.broadcast %cst_42 : f32 to vector<1x512xf32>
    %113 = arith.subf %112, %0 : vector<1x512xf32>
    %114 = arith.mulf %113, %101 : vector<1x512xf32>
    %cst_43 = arith.constant 2.000000e+00 : f32
    %115 = vector.broadcast %cst_43 : f32 to vector<1x512xf32>
    %116 = arith.mulf %115, %0 : vector<1x512xf32>
    %cst_44 = arith.constant 1.000000e+00 : f32
    %117 = vector.broadcast %cst_44 : f32 to vector<1x512xf32>
    %118 = arith.addf %117, %116 : vector<1x512xf32>
    %119 = arith.mulf %118, %111 : vector<1x512xf32>
    %120 = arith.addf %114, %119 : vector<1x512xf32>
    %121 = vector.shape_cast %120 : vector<1x512xf32> to vector<1x1x512xf32>
    %cst_45 = arith.constant dense<0.000000e+00> : vector<1xf32>
    %122 = vector.multi_reduction <add>, %121, %cst_45 [1, 2] : vector<1x1x512xf32> to vector<1xf32>
    %123 = vector.shape_cast %122 : vector<1xf32> to vector<1x1x1xf32>
    %124 = vector.extract %123[0, 0, 0] : f32 from vector<1x1x1xf32>
    %125 = arith.addf %100, %124 : f32
    %c0_46 = arith.constant 0 : index
    %c0_47 = arith.constant 0 : index
    %126 = vector.load %arg6[%c0_46, %c0_47] : memref<1x512xf32, #tpu.memory_space<vmem>>, vector<1x512xf32>
    %cst_48 = arith.constant 0.000000e+00 : f32
    %127 = vector.broadcast %cst_48 : f32 to vector<1x512xf32>
    %128 = arith.subf %127, %126 : vector<1x512xf32>
    %cst_49 = arith.constant 0.000000e+00 : f32
    %129 = vector.broadcast %cst_49 : f32 to vector<1x512xf32>
    %130 = arith.maximumf %128, %129 : vector<1x512xf32>
    %131 = math.absf %126 : vector<1x512xf32>
    %cst_50 = arith.constant 0.000000e+00 : f32
    %132 = vector.broadcast %cst_50 : f32 to vector<1x512xf32>
    %133 = arith.subf %132, %131 : vector<1x512xf32>
    %134 = math.exp %133 : vector<1x512xf32>
    %135 = math.log1p %134 : vector<1x512xf32>
    %136 = arith.addf %130, %135 : vector<1x512xf32>
    %cst_51 = arith.constant 1.000000e+00 : f32
    %137 = vector.broadcast %cst_51 : f32 to vector<1x512xf32>
    %138 = arith.subf %137, %0 : vector<1x512xf32>
    %139 = arith.mulf %138, %126 : vector<1x512xf32>
    %cst_52 = arith.constant 2.000000e+00 : f32
    %140 = vector.broadcast %cst_52 : f32 to vector<1x512xf32>
    %141 = arith.mulf %140, %0 : vector<1x512xf32>
    %cst_53 = arith.constant 1.000000e+00 : f32
    %142 = vector.broadcast %cst_53 : f32 to vector<1x512xf32>
    %143 = arith.addf %142, %141 : vector<1x512xf32>
    %144 = arith.mulf %143, %136 : vector<1x512xf32>
    %145 = arith.addf %139, %144 : vector<1x512xf32>
    %146 = vector.shape_cast %145 : vector<1x512xf32> to vector<1x1x512xf32>
    %cst_54 = arith.constant dense<0.000000e+00> : vector<1xf32>
    %147 = vector.multi_reduction <add>, %146, %cst_54 [1, 2] : vector<1x1x512xf32> to vector<1xf32>
    %148 = vector.shape_cast %147 : vector<1xf32> to vector<1x1x1xf32>
    %149 = vector.extract %148[0, 0, 0] : f32 from vector<1x1x1xf32>
    %150 = arith.addf %125, %149 : f32
    %151 = vector.broadcast %150 : f32 to vector<8x128xf32>
    %c0_55 = arith.constant 0 : index
    %c0_56 = arith.constant 0 : index
    %152 = vector.load %arg8[%c0_55, %c0_56] : memref<8x128xf32, #tpu.memory_space<vmem>>, vector<8x128xf32>
    tpu.vector_store %arg8[%c0_55, %c0_56], %151 {strides = array<i32>} : memref<8x128xf32, #tpu.memory_space<vmem>>, vector<8x128xf32>,
    return
  }
  func.func @transform_0(%arg0: i32) -> (i32, i32) {
    %c0_i32 = arith.constant 0 : i32
    %c0_i32_0 = arith.constant 0 : i32
    return %arg0, %c0_i32 : i32, i32
  }
  func.func @transform_1(%arg0: i32) -> (i32, i32) {
    %c0_i32 = arith.constant 0 : i32
    %c0_i32_0 = arith.constant 0 : i32
    return %arg0, %c0_i32 : i32, i32
  }
  func.func @transform_2(%arg0: i32) -> (i32, i32) {
    %c0_i32 = arith.constant 0 : i32
    %c0_i32_0 = arith.constant 0 : i32
    return %arg0, %c0_i32 : i32, i32
  }
  func.func @transform_3(%arg0: i32) -> (i32, i32) {
    %c0_i32 = arith.constant 0 : i32
    %c0_i32_0 = arith.constant 0 : i32
    return %arg0, %c0_i32 : i32, i32
  }
  func.func @transform_4(%arg0: i32) -> (i32, i32) {
    %c0_i32 = arith.constant 0 : i32
    %c0_i32_0 = arith.constant 0 : i32
    return %arg0, %c0_i32 : i32, i32
  }
  func.func @transform_5(%arg0: i32) -> (i32, i32) {
    %c0_i32 = arith.constant 0 : i32
    %c0_i32_0 = arith.constant 0 : i32
    return %arg0, %c0_i32 : i32, i32
  }
  func.func @transform_6(%arg0: i32) -> (i32, i32) {
    %c0_i32 = arith.constant 0 : i32
    %c0_i32_0 = arith.constant 0 : i32
    return %arg0, %c0_i32 : i32, i32
  }
  func.func @transform_7(%arg0: i32) -> (i32, i32) {
    %c0_i32 = arith.constant 0 : i32
    %c0_i32_0 = arith.constant 0 : i32
    return %arg0, %c0_i32 : i32, i32
  }
}

</mosaic_0001>

<bundles_post_ra>
// kernel: squeeze.9
= control target key start
LH: loop header
LB: loop body
LE: loop exit
PB: predicated region body
PF: predicated region fallthrough
CT: control target
= control target key end

     0   :  { %s94_s8 = smov 112   ;;  %s95_s11 = smov 80   ;;  %vm3_vm0 = vcmask 130048   ;;  %vm9_vm1 = vcmask 1048448   ;;  %vm15_vm2 = vcmask 917248   ;;  %vm21_vm3 = vcmask 786048   ;;  %s147_s0 = inlined_call_operand.vmem [shape: f32[2,1,16,16], index: 0, kind: input, shape index: {}]   ;;  %s148_s1 = inlined_call_operand.vmem [shape: f32[1,512], index: 1, kind: output, shape index: {}]  }
   0x1   :  { %v77_v0 = vld [vmem:[%s147_s0 + $0x7] ss:$8 sm:$0xf]   ;;  %v79_v1 = vld [vmem:[%s147_s0 + $0x5] ss:$8 sm:$0xf]  }
   0x2   :  { %7 = vrot.lane.b32.xlu0 %v77_v0, %s94_s8  ;;  %19 = vrot.lane.b32.xlu1 %v79_v1, %s95_s11  ;;  %v78_v2 = vld [vmem:[%s147_s0 + $0x6] ss:$8 sm:$0xf]   ;;  %v80_v3 = vld [vmem:[%s147_s0 + $0x4] ss:$8 sm:$0xf]  }
   0x3   :  { %s96_s16 = smov 96   ;;  %v2_v4 = vld [vmem:[%s147_s0] ss:$8 sm:$0xf]   ;;  %s97_s19 = smov 64   ;;  %vm27_vm4 = vcmask 654848  }
   0x4   :  { %v81_v5 = vld [vmem:[%s147_s0 + $0x3] ss:$8 sm:$0xf]   ;;  %4 = vst.msk [vmem:[#allocation0] ss:$8 sm:$0xf] %vm3_vm0, %v2_v4  }
   0x5   :  { %v82_v6 = vld [vmem:[%s147_s0 + $0x2] ss:$8 sm:$0xf]   ;;  %s98_s24 = smov 48   ;;  %s99_s25 = smov 32   ;;  %vm33_vm5 = vcmask 523648  }
   0x6   :  { %13 = vrot.lane.b32.xlu0 %v78_v2, %s96_s16  ;;  %25 = vrot.lane.b32.xlu1 %v80_v3, %s97_s19  ;;  %v83_v7 = vld [vmem:[%s147_s0 + $0x1] ss:$8 sm:$0xf]   ;;  %s100_s0 = smov 16   ;;  %vm39_vm6 = vcmask 392448   ;;  %vm45_vm7 = vcmask 261248  }
   0xa   :  { %31 = vrot.lane.b32.xlu0 %v81_v5, %s98_s24  ;;  %37 = vrot.lane.b32.xlu1 %v82_v6, %s99_s25 }
   0xe   :  { %43 = vrot.lane.b32.xlu0 %v83_v7, %s100_s0 }
  0x74   :  { %v8_v8 = vpop.permute.xlu0 %7   ;;  %v20_v9 = vpop.permute.xlu1 %19  }
  0x75   :  { %10 = vst.msk [vmem:[#allocation0] ss:$8 sm:$0xf] %vm9_vm1, %v8_v8  }
  0x78   :  { %v14_v10 = vpop.permute.xlu0 %13   ;;  %v26_v11 = vpop.permute.xlu1 %25  }
  0x79   :  { %16 = vst.msk [vmem:[#allocation0] ss:$8 sm:$0xf] %vm15_vm2, %v14_v10  }
  0x7a   :  { %22 = vst.msk [vmem:[#allocation0] ss:$8 sm:$0xf] %vm21_vm3, %v20_v9  }
  0x7b   :  { %28 = vst.msk [vmem:[#allocation0] ss:$8 sm:$0xf] %vm27_vm4, %v26_v11  }
  0x7c   :  { %v32_v12 = vpop.permute.xlu0 %31   ;;  %v38_v13 = vpop.permute.xlu1 %37  }
  0x7d   :  { %34 = vst.msk [vmem:[#allocation0] ss:$8 sm:$0xf] %vm33_vm5, %v32_v12  }
  0x7e   :  { %40 = vst.msk [vmem:[#allocation0] ss:$8 sm:$0xf] %vm39_vm6, %v38_v13  }
  0x80   :  { %v44_v14 = vpop.permute.xlu0 %43  }
  0x81   :  { %46 = vst.msk [vmem:[#allocation0] ss:$8 sm:$0xf] %vm45_vm7, %v44_v14  }
  0x88   :  { %v51_v15 = vld [vmem:[#allocation0] sm:$0x1]  ;;  %v56_v16 = vld [vmem:[#allocation0 + $0x8] sm:$0x1]  ;;  %v62_v17 = vld [vmem:[#allocation0 + $0x10] sm:$0x1] }
  0x89   :  { %54 = vst [vmem:[%s148_s1] sm:$0x1] %v51_v15  ;;  %84 = vst [vmem:[%s148_s1 + $0x1] sm:$0x1] %v56_v16  ;;  %v69_v18 = vld [vmem:[#allocation0 + $0x18] sm:$0x1] }
  0x8a   :  { %85 = vst [vmem:[%s148_s1 + $0x2] sm:$0x1] %v62_v17  ;;  %86 = vst [vmem:[%s148_s1 + $0x3] sm:$0x1] %v69_v18 }

// kernel: squeeze.8
= control target key start
LH: loop header
LB: loop body
LE: loop exit
PB: predicated region body
PF: predicated region fallthrough
CT: control target
= control target key end

     0   :  { %2 = vsyncpa [#allocation1], 0  ;;  %s121_s6 = smov [#allocation0]   ;;  %s154_s0 = inlined_call_operand.hbm [shape: f32[2,1,16,16], index: 0, kind: input, shape index: {}]   ;;  %s155_s1 = inlined_call_operand.vmem [shape: f32[1,512], index: 1, kind: output, shape index: {}]  }
   0x1   :  { %s7_s7 = sshll.u32 %s121_s6, 4  ;;  %s8_s7 = int_to_ptr.vmem [resolvable:$true] %s7_s7 }
   0x2   :  { %s107_s8 = scalar_lea.vmem %s8_s7, 512  ;;  %p112_p1 = scmp.lt.s32.totalorder %s8_s7, %s8_s7 }
   0x3   :  { %p108_p0 = scmp.ne.s32.totalorder %s8_s7, %s107_s8  ;;  %p113_p2 = scmp.lt.s32.totalorder %s107_s8, %s107_s8 }
   0x5   :  { %p114_p3 = por %p113_p2, %p112_p1 }
   0x7   :  { %p115_p4 = pnand %p114_p3, %p108_p0 }
   0x9   :  { %118 = shalt.err (!%p115_p4)
}
   0xa   :  { %10 = dma.hbm_to_vmem [thread:$0]  %s154_s0, 512, %s8_s7, [#allocation1]  }
   0xb   :  { %119 = dma.done.wait [#allocation1], 512  }
   0xc   :  { %120 = vsyncadd [#allocation1], 4294966784  ;;  %v16_v0 = vld [vmem:[#allocation0 + $0x7] ss:$8 sm:$0xf]   ;;  %s122_s0 = smov 112  }
   0xd   :  { %v28_v1 = vld [vmem:[#allocation0 + $0x5] ss:$8 sm:$0xf]   ;;  %17 = vrot.lane.b32.xlu0 %v16_v0, %s122_s0  ;;  %s123_s11 = smov 80   ;;  %vm13_vm0 = vcmask 130048   ;;  %s124_s12 = smov 96  }
   0xe   :  { %29 = vrot.lane.b32.xlu1 %v28_v1, %s123_s11  ;;  %v22_v2 = vld [vmem:[#allocation0 + $0x6] ss:$8 sm:$0xf]   ;;  %v34_v3 = vld [vmem:[#allocation0 + $0x4] ss:$8 sm:$0xf]  }
   0xf   :  { %v12_v4 = vld [vmem:[#allocation0] ss:$8 sm:$0xf]   ;;  %s125_s13 = smov 64   ;;  %s126_s14 = smov 48   ;;  %vm19_vm1 = vcmask 1048448  }
  0x10   :  { %14 = vst.msk [vmem:[#allocation2] ss:$8 sm:$0xf] %vm13_vm0, %v12_v4   ;;  %v40_v5 = vld [vmem:[#allocation0 + $0x3] ss:$8 sm:$0xf]  }
  0x11   :  { %23 = vrot.lane.b32.xlu0 %v22_v2, %s124_s12  ;;  %v46_v6 = vld [vmem:[#allocation0 + $0x2] ss:$8 sm:$0xf]   ;;  %s127_s15 = smov 32   ;;  %s128_s16 = smov 16   ;;  %vm25_vm2 = vcmask 917248  }
  0x12   :  { %35 = vrot.lane.b32.xlu1 %v34_v3, %s125_s13  ;;  %v52_v7 = vld [vmem:[#allocation0 + $0x1] ss:$8 sm:$0xf]   ;;  %vm31_vm3 = vcmask 786048   ;;  %vm37_vm4 = vcmask 654848   ;;  %vm43_vm5 = vcmask 523648  }
  0x13   :  { %vm49_vm6 = vcmask 392448   ;;  %vm55_vm7 = vcmask 261248  }
  0x15   :  { %41 = vrot.lane.b32.xlu0 %v40_v5, %s126_s14 }
  0x16   :  { %47 = vrot.lane.b32.xlu1 %v46_v6, %s127_s15 }
  0x19   :  { %53 = vrot.lane.b32.xlu0 %v52_v7, %s128_s16 }
  0x7f   :  { %v18_v8 = vpop.permute.xlu0 %17  }
  0x80   :  { %v30_v9 = vpop.permute.xlu1 %29   ;;  %20 = vst.msk [vmem:[#allocation2] ss:$8 sm:$0xf] %vm19_vm1, %v18_v8  }
  0x83   :  { %v24_v10 = vpop.permute.xlu0 %23  }
  0x84   :  { %v36_v11 = vpop.permute.xlu1 %35   ;;  %26 = vst.msk [vmem:[#allocation2] ss:$8 sm:$0xf] %vm25_vm2, %v24_v10  }
  0x85   :  { %32 = vst.msk [vmem:[#allocation2] ss:$8 sm:$0xf] %vm31_vm3, %v30_v9  }
  0x86   :  { %38 = vst.msk [vmem:[#allocation2] ss:$8 sm:$0xf] %vm37_vm4, %v36_v11  }
  0x87   :  { %v42_v12 = vpop.permute.xlu0 %41  }
  0x88   :  { %v48_v13 = vpop.permute.xlu1 %47   ;;  %44 = vst.msk [vmem:[#allocation2] ss:$8 sm:$0xf] %vm43_vm5, %v42_v12  }
  0x89   :  { %50 = vst.msk [vmem:[#allocation2] ss:$8 sm:$0xf] %vm49_vm6, %v48_v13  }
  0x8b   :  { %v54_v14 = vpop.permute.xlu0 %53  }
  0x8c   :  { %56 = vst.msk [vmem:[#allocation2] ss:$8 sm:$0xf] %vm55_vm7, %v54_v14  }
  0x93   :  { %v61_v15 = vld [vmem:[#allocation2] sm:$0x1]  ;;  %v66_v16 = vld [vmem:[#allocation2 + $0x8] sm:$0x1]  ;;  %v72_v17 = vld [vmem:[#allocation2 + $0x10] sm:$0x1] }
  0x94   :  { %64 = vst [vmem:[%s155_s1] sm:$0x1] %v61_v15  ;;  %88 = vst [vmem:[%s155_s1 + $0x1] sm:$0x1] %v66_v16  ;;  %v79_v18 = vld [vmem:[#allocation2 + $0x18] sm:$0x1] }
  0x95   :  { %89 = vst [vmem:[%s155_s1 + $0x2] sm:$0x1] %v72_v17  ;;  %90 = vst [vmem:[%s155_s1 + $0x3] sm:$0x1] %v79_v18 }
  0x96   :  { %85 = vsyncpa [#allocation1], 1 }

// kernel: rcf_loss.1
= control target key start
LH: loop header
LB: loop body
LE: loop exit
PB: predicated region body
PF: predicated region fallthrough
CT: control target
= control target key end

     0   :  { %v51_v28 = vlaneseq  ;;  %vm71_vm1 = vcmask 1040384   ;;  %s644_s2 = inlined_call_operand.vmem [shape: f32[1,512], index: 2, kind: input, shape index: {}]   ;;  %s645_s0 = inlined_call_operand.vmem [shape: f32[1,512], index: 0, kind: input, shape index: {}]   ;;  %s646_s3 = inlined_call_operand.vmem [shape: f32[1,512], index: 3, kind: input, shape index: {}]   ;;  %s647_s1 = inlined_call_operand.vmem [shape: f32[1,512], index: 1, kind: input, shape index: {}]   ;;  %s648_s5 = inlined_call_operand.vmem [shape: f32[1,512], index: 5, kind: input, shape index: {}]   ;;  %s649_s4 = inlined_call_operand.vmem [shape: f32[1,512], index: 4, kind: input, shape index: {}]   ;;  %s650_s6 = inlined_call_operand.vmem [shape: f32[1,512], index: 6, kind: input, shape index: {}]   ;;  %s651_s7 = inlined_call_operand.vmem [shape: f32[8,128], index: 7, kind: output, shape index: {}]  }
   0x1   :  { %v464_v0 = vld [vmem:[%s644_s2] sm:$0xf] }
   0x2   :  { %v469_v1 = vld [vmem:[%s645_s0] sm:$0xf]  ;;  %v150_v2 = vand.u32 2147483647, %v464_v0  ;;  %v52_v35 = vshrl.u32 %v51_v28, 7  ;;  %v148_v41 = vsub.f32 0.0, %v464_v0 }
   0x3   :  { %v30_v3 = vand.u32 2147483647, %v469_v1  ;;  %v476_v4 = vld [vmem:[%s646_s3] sm:$0xf]  ;;  %v28_v42 = vsub.f32 0.0, %v469_v1 }
   0x4   :  { %v151_v5 = vsub.f32 0.0, %v150_v2  ;;  %v481_v6 = vld [vmem:[%s647_s1] sm:$0xf]  ;;  %v208_v10 = vand.u32 2147483647, %v476_v4  ;;  %v206_v45 = vsub.f32 0.0, %v476_v4 }
   0x5   :  { %v31_v7 = vsub.f32 0.0, %v30_v3  ;;  %v486_v8 = vld [vmem:[%s648_s5] sm:$0xf]  ;;  %v92_v12 = vand.u32 2147483647, %v481_v6  ;;  %v516_v47 = vsub.s32 0, %v52_v35 }
   0x6   :  { %v152_v9 = vmul.f32 1.442695, %v151_v5  ;;  %v493_v13 = vld [vmem:[%s649_s4] sm:$0xf]  ;;  %v209_v14 = vsub.f32 0.0, %v208_v10  ;;  %v518_v48 = vsub.s32 1, %v52_v35 }
   0x7   :  { %v32_v11 = vmul.f32 1.442695, %v31_v7  ;;  %v324_v15 = vand.u32 2147483647, %v486_v8  ;;  %v93_v16 = vsub.f32 0.0, %v92_v12  ;;  %v520_v49 = vsub.s32 2, %v52_v35 }
   0x8   :  { %397 = vpow2.f32 %v152_v9  ;;  %v210_v17 = vmul.f32 1.442695, %v209_v14  ;;  %v266_v19 = vand.u32 2147483647, %v493_v13  ;;  %v26_v27 = vld [vmem:[%s650_s6] sm:$0xf] }
   0x9   :  { %399 = vpow2.f32 %v32_v11  ;;  %v325_v18 = vsub.f32 0.0, %v324_v15  ;;  %v94_v20 = vmul.f32 1.442695, %v93_v16  ;;  %v46_v32 = vmul.f32 2.0, %v26_v27 }
   0xa   :  { %401 = vpow2.f32 %v210_v17  ;;  %v267_v22 = vsub.f32 0.0, %v266_v19  ;;  %v505_v37 = vsub.f32 1.0, %v26_v27  ;;  %v90_v50 = vsub.f32 0.0, %v481_v6 }
   0xb   :  { %v326_v21 = vmul.f32 1.442695, %v325_v18  ;;  %403 = vpow2.f32 %v94_v20  ;;  %v512_v44 = vadd.f32 1.0, %v46_v32  ;;  %v523_v51 = vsub.s32 3, %v52_v35 }
   0xc   :  { %v268_v23 = vmul.f32 1.442695, %v267_v22  ;;  %v149_v54 = vmax.f32 %v148_v41, 0.0  ;;  %v164_v58 = vmul.f32 %v464_v0, %v505_v37  ;;  %v29_v59 = vmax.f32 %v28_v42, 0.0 }
   0xd   :  { %405 = vpow2.f32 %v326_v21  ;;  %v45_v61 = vmul.f32 %v505_v37, %v469_v1  ;;  %v207_v62 = vmax.f32 %v206_v45, 0.0  ;;  %v91_v2 = vmax.f32 %v90_v50, 0.0 }
   0xe   :  { %407 = vpow2.f32 %v268_v23  ;;  %v322_v3 = vsub.f32 0.0, %v486_v8  ;;  %v264_v10 = vsub.f32 0.0, %v493_v13  ;;  %v544_v18 = vmul.f32 %v476_v4, %v505_v37 }
   0xf   :  { %v106_v22 = vmul.f32 %v481_v6, %v505_v37 }
  0x10   :  { %v265_v45 = vmax.f32 %v264_v10, 0.0 }
  0x15   :  { %v398_v24 = vpop.eup %397 }
  0x16   :  { %v400_v25 = vpop.eup %399  ;;  %v154_v26 = vadd.f32 1.0, %v398_v24  ;;  %v157_v38 = vmul.f32 -0.5, %v398_v24  ;;  %v160_v55 = vand.u32 2147483647, %v398_v24 }
  0x17   :  { %v34_v29 = vadd.f32 1.0, %v400_v25  ;;  %v402_v30 = vpop.eup %401  ;;  %v37_v43 = vmul.f32 -0.5, %v400_v25  ;;  %v40_v60 = vand.u32 2147483647, %v400_v25 }
  0x18   :  { %409 = vlog2.f32 %v154_v26  ;;  %v500_v31 = vpop.eup %403  ;;  %v212_v33 = vadd.f32 1.0, %v402_v30  ;;  %v158_v52 = vadd.f32 1.0, %v157_v38  ;;  %v215_v53 = vmul.f32 -0.5, %v402_v30 }
  0x19   :  { %411 = vlog2.f32 %v34_v29  ;;  %v96_v36 = vadd.f32 1.0, %v500_v31  ;;  %v38_v56 = vadd.f32 1.0, %v37_v43  ;;  %v99_v57 = vmul.f32 -0.5, %v500_v31 }
  0x1a   :  { %v502_v34 = vpop.eup %405  ;;  %413 = vlog2.f32 %v212_v33  ;;  %v218_v63 = vand.u32 2147483647, %v402_v30  ;;  %v159_v5 = vmul.f32 %v398_v24, %v158_v52  ;;  %v216_v7 = vadd.f32 1.0, %v215_v53 }
  0x1b   :  { %v328_v39 = vadd.f32 1.0, %v502_v34  ;;  %v508_v40 = vpop.eup %407  ;;  %415 = vlog2.f32 %v96_v36  ;;  %v331_v9 = vmul.f32 -0.5, %v502_v34  ;;  %vm533_vm0 = vcmp.lt.f32.partialorder %v160_v55, 0.0004427343 }
  0x1c   :  { %v270_v46 = vadd.f32 1.0, %v508_v40  ;;  %v39_v0 = vmul.f32 %v400_v25, %v38_v56  ;;  %v100_v14 = vadd.f32 1.0, %v99_v57  ;;  %v273_v1 = vmul.f32 -0.5, %v508_v40 }
  0x1d   :  { %417 = vlog2.f32 %v328_v39  ;;  %vm538_vm2 = vcmp.lt.f32.partialorder %v40_v60, 0.0004427343  ;;  %v102_v19 = vand.u32 2147483647, %v500_v31  ;;  %vm547_vm3 = vcmp.lt.f32.partialorder %v218_v63, 0.0004427343 }
  0x1e   :  { %419 = vlog2.f32 %v270_v46  ;;  %v334_v23 = vand.u32 2147483647, %v502_v34  ;;  %v217_v25 = vmul.f32 %v402_v30, %v216_v7  ;;  %v332_v26 = vadd.f32 1.0, %v331_v9 }
  0x1f   :  { %v276_v4 = vand.u32 2147483647, %v508_v40  ;;  %v101_v32 = vmul.f32 %v500_v31, %v100_v14  ;;  %v274_v33 = vadd.f32 1.0, %v273_v1  ;;  %vm560_vm4 = vcmp.lt.f32.partialorder %v102_v19, 0.0004427343 }
  0x20   :  { %v323_v39 = vmax.f32 %v322_v3, 0.0  ;;  %vm565_vm5 = vcmp.lt.f32.partialorder %v334_v23, 0.0004427343  ;;  %v333_v50 = vmul.f32 %v502_v34, %v332_v26 }
  0x21   :  { %vm573_vm6 = vcmp.lt.f32.partialorder %v276_v4, 0.0004427343  ;;  %v275_v57 = vmul.f32 %v508_v40, %v274_v33 }
  0x25   :  { %v410_v11 = vpop.eup %409 }
  0x26   :  { %v412_v15 = vpop.eup %411  ;;  %v156_v16 = vmul.f32 0.6931472, %v410_v11 }
  0x27   :  { %v36_v20 = vmul.f32 0.6931472, %v412_v15  ;;  %v414_v27 = vpop.eup %413 }
  0x28   :  { %v162_v24 = vsel %vm533_vm0, %v159_v5, %v156_v16  ;;  %v416_v35 = vpop.eup %415  ;;  %v214_v6 = vmul.f32 0.6931472, %v414_v27 }
  0x29   :  { %v163_v28 = vadd.f32 %v162_v24, %v149_v54  ;;  %v42_v29 = vsel %vm538_vm2, %v39_v0, %v36_v20  ;;  %v98_v42 = vmul.f32 0.6931472, %v416_v35 }
  0x2a   :  { %v43_v36 = vadd.f32 %v42_v29, %v29_v59  ;;  %v418_v30 = vpop.eup %417  ;;  %v220_v46 = vsel %vm547_vm3, %v217_v25, %v214_v6  ;;  %v338_v29 = vmul.f32 %v486_v8, %v505_v37 }
  0x2b   :  { %v165_v41 = vmul.f32 %v163_v28, %v512_v44  ;;  %v420_v53 = vpop.eup %419  ;;  %v104_v55 = vsel %vm560_vm4, %v101_v32, %v98_v42  ;;  %v330_v56 = vmul.f32 0.6931472, %v418_v30  ;;  %v221_v60 = vadd.f32 %v220_v46, %v207_v62 }
  0x2c   :  { %v48_v31 = vmul.f32 %v512_v44, %v43_v36  ;;  %v105_v63 = vadd.f32 %v104_v55, %v91_v2  ;;  %v272_v3 = vmul.f32 0.6931472, %v420_v53 }
  0x2d   :  { %v166_v54 = vadd.f32 %v165_v41, %v164_v58  ;;  %v336_v12 = vsel %vm565_vm5, %v333_v50, %v330_v56  ;;  %v223_v19 = vmul.f32 %v221_v60, %v512_v44  ;;  %v280_v50 = vmul.f32 %v493_v13, %v505_v37 }
  0x2e   :  { %v49_v59 = vadd.f32 %v48_v31, %v45_v61  ;;  %v107_v20 = vmul.f32 %v105_v63, %v512_v44  ;;  %v337_v24 = vadd.f32 %v336_v12, %v323_v39  ;;  %v278_v25 = vsel %vm573_vm6, %v275_v57, %v272_v3 }
  0x2f   :  { %v171_v5 = vrot.slane %v166_v54, %v516_v47  ;;  %v175_v34 = vrot.slane %v166_v54, %v518_v48  ;;  %v179_v7 = vrot.slane %v166_v54, %v520_v49  ;;  %v183_v9 = vrot.slane %v166_v54, %v523_v51 }
  0x30   :  { %v54_v58 = vrot.slane %v49_v59, %v516_v47  ;;  %v58_v10 = vrot.slane %v49_v59, %v518_v48  ;;  %v62_v11 = vrot.slane %v49_v59, %v520_v49  ;;  %v66_v40 = vrot.slane %v49_v59, %v523_v51 }
  0x31   :  { %v188_v61 = vsel %vm71_vm1, %v171_v5, 0.0  ;;  %v189_v62 = vsel %vm71_vm1, %v175_v34, 0.0  ;;  %v191_v2 = vsel %vm71_vm1, %v179_v7, 0.0  ;;  %v193_v16 = vsel %vm71_vm1, %v183_v9, 0.0 }
  0x32   :  { %v190_v0 = vadd.f32 %v189_v62, %v188_v61  ;;  %v72_v14 = vsel %vm71_vm1, %v54_v58, 0.0  ;;  %v73_v1 = vsel %vm71_vm1, %v58_v10, 0.0  ;;  %v75_v15 = vsel %vm71_vm1, %v62_v11, 0.0 }
  0x33   :  { %v74_v17 = vadd.f32 %v73_v1, %v72_v14  ;;  %v77_v23 = vsel %vm71_vm1, %v66_v40, 0.0  ;;  %v224_v4 = vadd.f32 %v223_v19, %v544_v18  ;;  %v108_v27 = vadd.f32 %v107_v20, %v106_v22 }
  0x34   :  { %v192_v21 = vadd.f32 %v191_v2, %v190_v0  ;;  %v339_v32 = vmul.f32 %v337_v24, %v512_v44  ;;  %v279_v33 = vadd.f32 %v278_v25, %v265_v45 }
  0x35   :  { %v76_v26 = vadd.f32 %v75_v15, %v74_v17  ;;  %v229_v36 = vrot.slane %v224_v4, %v516_v47  ;;  %v233_v6 = vrot.slane %v224_v4, %v518_v48  ;;  %v237_v38 = vrot.slane %v224_v4, %v520_v49 }
  0x36   :  { %v194_v28 = vadd.f32 %v193_v16, %v192_v21  ;;  %v241_v39 = vrot.slane %v224_v4, %v523_v51  ;;  %v113_v18 = vrot.slane %v108_v27, %v516_v47  ;;  %v117_v22 = vrot.slane %v108_v27, %v518_v48 }
  0x37   :  { %v78_v35 = vadd.f32 %v77_v23, %v76_v26  ;;  %v121_v30 = vrot.slane %v108_v27, %v520_v49  ;;  %v246_v8 = vsel %vm71_vm1, %v229_v36, 0.0  ;;  %v247_v41 = vsel %vm71_vm1, %v233_v6, 0.0 }
  0x38   :  { %195 = vadd.xlane.f32.xlu1 %v194_v28  ;;  %v249_v42 = vsel %vm71_vm1, %v237_v38, 0.0  ;;  %v125_v43 = vrot.slane %v108_v27, %v523_v51  ;;  %v248_v45 = vadd.f32 %v247_v41, %v246_v8  ;;  %v130_v31 = vsel %vm71_vm1, %v113_v18, 0.0 }
  0x39   :  { %79 = vadd.xlane.f32.xlu0 %v78_v35  ;;  %v131_v46 = vsel %vm71_vm1, %v117_v22, 0.0  ;;  %v251_v52 = vsel %vm71_vm1, %v241_v39, 0.0  ;;  %v133_v54 = vsel %vm71_vm1, %v121_v30, 0.0  ;;  %v340_v55 = vadd.f32 %v339_v32, %v338_v29 }
  0x3a   :  { %v132_v53 = vadd.f32 %v131_v46, %v130_v31  ;;  %v250_v56 = vadd.f32 %v249_v42, %v248_v45  ;;  %v135_v57 = vsel %vm71_vm1, %v125_v43, 0.0  ;;  %v281_v59 = vmul.f32 %v279_v33, %v512_v44 }
  0x3b   :  { %v345_v63 = vrot.slane %v340_v55, %v516_v47  ;;  %v349_v3 = vrot.slane %v340_v55, %v518_v48  ;;  %v353_v5 = vrot.slane %v340_v55, %v520_v49  ;;  %v357_v13 = vrot.slane %v340_v55, %v523_v51 }
  0x3c   :  { %v134_v60 = vadd.f32 %v133_v54, %v132_v53  ;;  %v252_v34 = vadd.f32 %v251_v52, %v250_v56  ;;  %v282_v37 = vadd.f32 %v281_v59, %v280_v50 }
  0x3d   :  { %v362_v9 = vsel %vm71_vm1, %v345_v63, 0.0  ;;  %v363_v58 = vsel %vm71_vm1, %v349_v3, 0.0  ;;  %v365_v10 = vsel %vm71_vm1, %v353_v5, 0.0  ;;  %v367_v61 = vsel %vm71_vm1, %v357_v13, 0.0 }
  0x3e   :  { %v136_v7 = vadd.f32 %v135_v57, %v134_v60  ;;  %253 = vadd.xlane.f32.xlu1 %v252_v34  ;;  %v364_v44 = vadd.f32 %v363_v58, %v362_v9  ;;  %v287_v11 = vrot.slane %v282_v37, %v516_v47  ;;  %v291_v40 = vrot.slane %v282_v37, %v518_v48 }
  0x3f   :  { %v295_v62 = vrot.slane %v282_v37, %v520_v49  ;;  %v299_v2 = vrot.slane %v282_v37, %v523_v51 }
  0x40   :  { %137 = vadd.xlane.f32.xlu0 %v136_v7  ;;  %v366_v12 = vadd.f32 %v365_v10, %v364_v44  ;;  %v304_v0 = vsel %vm71_vm1, %v287_v11, 0.0  ;;  %v305_v14 = vsel %vm71_vm1, %v291_v40, 0.0 }
  0x41   :  { %v306_v1 = vadd.f32 %v305_v14, %v304_v0  ;;  %v307_v15 = vsel %vm71_vm1, %v295_v62, 0.0  ;;  %v309_v47 = vsel %vm71_vm1, %v299_v2, 0.0 }
  0x42   :  { %v368_v16 = vadd.f32 %v367_v61, %v366_v12 }
  0x43   :  { %v308_v17 = vadd.f32 %v307_v15, %v306_v1 }
  0x44   :  { %369 = vadd.xlane.f32.xlu1 %v368_v16 }
  0x45   :  { %v310_v48 = vadd.f32 %v309_v47, %v308_v17 }
  0x47   :  { %311 = vadd.xlane.f32.xlu0 %v310_v48 }
  0xc1   :  { %v196_v19 = vpop.xlane.xlu1 %195 }
  0xc2   :  { %v197_v20 = vrot.slane %v196_v19, 4  ;;  %v80_v49 = vpop.xlane.xlu0 %79 }
  0xc3   :  { %v81_v21 = vrot.slane %v80_v49, 4 }
  0xc4   :  { %v198_v23 = vadd.f32 %v197_v20, %v196_v19 }
  0xc5   :  { %v82_v51 = vadd.f32 %v81_v21, %v80_v49 }
  0xc6   :  { %v199_v4 = vrot.slane %v198_v23, 2 }
  0xc7   :  { %v83_v24 = vrot.slane %v82_v51, 2  ;;  %v254_v25 = vpop.xlane.xlu1 %253 }
  0xc8   :  { %v255_v27 = vrot.slane %v254_v25, 4  ;;  %v200_v38 = vadd.f32 %v199_v4, %v198_v23 }
  0xc9   :  { %v84_v26 = vadd.f32 %v83_v24, %v82_v51  ;;  %v138_v28 = vpop.xlane.xlu0 %137 }
  0xca   :  { %v139_v29 = vrot.slane %v138_v28, 4  ;;  %v256_v33 = vadd.f32 %v255_v27, %v254_v25  ;;  %v201_v43 = vrot.slane %v200_v38, 1 }
  0xcb   :  { %v85_v32 = vrot.slane %v84_v26, 1 }
  0xcc   :  { %v140_v35 = vadd.f32 %v139_v29, %v138_v28  ;;  %v257_v6 = vrot.slane %v256_v33, 2  ;;  %v202_v56 = vadd.f32 %v201_v43, %v200_v38 }
  0xcd   :  { %v86_v36 = vadd.f32 %v85_v32, %v84_v26  ;;  %v370_v18 = vpop.xlane.xlu1 %369 }
  0xce   :  { %v141_v39 = vrot.slane %v140_v35, 2  ;;  %v371_v22 = vrot.slane %v370_v18, 4  ;;  %v258_v30 = vadd.f32 %v257_v6, %v256_v33 }
  0xcf   :  { %385 = vpush %v86_v36 }
  0xd0   :  { %v142_v8 = vadd.f32 %v141_v39, %v140_v35  ;;  %v372_v41 = vadd.f32 %v371_v22, %v370_v18  ;;  %v312_v42 = vpop.xlane.xlu0 %311  ;;  %v259_v45 = vrot.slane %v258_v30, 1 }
  0xd1   :  { %v313_v31 = vrot.slane %v312_v42, 4 }
  0xd2   :  { %v143_v46 = vrot.slane %v142_v8, 1  ;;  %v373_v50 = vrot.slane %v372_v41, 2  ;;  %v260_v54 = vadd.f32 %v259_v45, %v258_v30 }
  0xd3   :  { %v314_v52 = vadd.f32 %v313_v31, %v312_v42 }
  0xd4   :  { %v144_v53 = vadd.f32 %v143_v46, %v142_v8  ;;  %v374_v55 = vadd.f32 %v373_v50, %v372_v41 }
  0xd5   :  { %v315_v57 = vrot.slane %v314_v52, 2 }
  0xd6   :  { %387 = vpush %v144_v53  ;;  %v375_v59 = vrot.slane %v374_v55, 1 }
  0xd7   :  { %389 = vpush %v202_v56  ;;  %v316_v60 = vadd.f32 %v315_v57, %v314_v52 }
  0xd8   :  { %391 = vpush %v260_v54  ;;  %v376_v3 = vadd.f32 %v375_v59, %v374_v55 }
  0xd9   :  { %v317_v63 = vrot.slane %v316_v60, 1 }
  0xdb   :  { %v318_v5 = vadd.f32 %v317_v63, %v316_v60 }
  0xdd   :  { %393 = vpush %v318_v5 }
  0xde   :  { %395 = vpush %v376_v3 }
 0x100   :  { %s386_s5 = spop %385 }
 0x107   :  { %s388_s6 = spop %387 }
 0x108   :  { %s146_s10 = sadd.f32 %s388_s6, %s386_s5  ;;  %s390_s11 = spop %389 }
 0x109   :  { %s392_s13 = spop %391 }
 0x10a   :  { %s204_s12 = sadd.f32 %s390_s11, %s146_s10 }
 0x10c   :  { %s262_s14 = sadd.f32 %s392_s13, %s204_s12 }
 0x10e   :  { %s394_s15 = spop %393 }
 0x10f   :  { %s320_s16 = sadd.f32 %s394_s15, %s262_s14  ;;  %s396_s17 = spop %395 }
 0x111   :  { %s378_s18 = sadd.f32 %s396_s17, %s320_s16 }
 0x113   :  { %v379_v34 = vstv %s378_s18 }
 0x114   :  { %380 = vst [vmem:[%s651_s7] sm:$0xff] %v379_v34 }

</bundles_post_ra>
